<compile_context>
chip_gen: v6e
topology: v6e:2x2x1
jax: 0.10.0
libtpu: 0.0.40
codegen_flags: <defaults>
</compile_context>

<pallas_src>
import functools

import jax
import jax.numpy as jnp
from jax.experimental import pallas as pl
from jax.experimental.pallas import tpu as pltpu

LANE = 128          # TPU lane width (batch axis maps to lanes in feature-major layout)
MAX_TILE_B = 2048   # batch elements per grid step (ld/st-knee per perf sweep advice)


def _mlp_kernel(c_ref, w1_ref, b1_ref, w2_ref, b2_ref, w3_ref, b3_ref,
                w4_ref, b4_ref, out_ref, *, matmul_dtype):
    """4-layer MLP with feature-major activations [features, TILE_B].

    The input block arrives batch-major [TILE_B, in_dim] (no wrapper transpose
    or pad); layer 1 contracts it transposed directly on the MXU.  Bias-add and
    ReLU epilogues stay in f32; only matmul operands are (optionally) bf16.
    """
    c = c_ref[...]                                     # [tile_b, in_dim]
    if c.dtype != matmul_dtype:
        c = c.astype(matmul_dtype)

    # Layer 1: contract in_dim of W1 [h, in] with in_dim of C [tb, in] -> [h, tb]
    h = jax.lax.dot_general(w1_ref[...], c, (((1,), (1,)), ((), ())),
                            preferred_element_type=jnp.float32)
    h = jnp.maximum(h + b1_ref[...], 0.0)              # f32 epilogue (v5e-safe)

    h = jnp.dot(w2_ref[...], h.astype(matmul_dtype),
                preferred_element_type=jnp.float32)
    h = jnp.maximum(h + b2_ref[...], 0.0)

    h = jnp.dot(w3_ref[...], h.astype(matmul_dtype),
                preferred_element_type=jnp.float32)
    h = jnp.maximum(h + b3_ref[...], 0.0)

    z = jnp.dot(w4_ref[...], h.astype(matmul_dtype),
                preferred_element_type=jnp.float32)
    out_ref[...] = (z + b4_ref[...]).astype(out_ref.dtype)   # [out_dim, tile_b] lane-dense


def _full_spec(shape):
    # Whole (small) weight / bias array, resident in VMEM every grid step.
    # Constant index_map -> Pallas does not re-DMA these across steps.
    return pl.BlockSpec(shape, lambda i: (0,) * len(shape))


def _round_up(x, m):
    return ((x + m - 1) // m) * m


@functools.partial(jax.jit, static_argnames=("use_bf16",))
def mlp_forward(C, params, use_bf16=False):
    """Pallas implementation of MLP.forward.

    C:       [B, input_size] float32 (native batch-major layout)
    params:  (w1, b1, w2, b2, w3, b3, w4, b4), w_l: [out_l, in_l], b_l: [out_l, 1]
    returns: [B, output_size] float32
    """
    w1, b1, w2, b2, w3, b3, w4, b4 = params
    B, in_dim = C.shape
    hidden = w1.shape[0]
    out_dim = w4.shape[0]

    matmul_dtype = jnp.bfloat16 if use_bf16 else jnp.float32
    if use_bf16:
        w1, w2, w3, w4 = (w.astype(jnp.bfloat16) for w in (w1, w2, w3, w4))

    # Balanced, lane-aligned batch tiles; >= 2 tiles whenever possible so the
    # "parallel" grid axis shards across both v7x TensorCores, and no near-empty
    # trailing tile for B just above MAX_TILE_B.
    num_tiles = max(2, pl.cdiv(B, MAX_TILE_B))
    tile_b = _round_up(pl.cdiv(B, num_tiles), LANE)
    grid = (pl.cdiv(B, tile_b),)

    kernel = functools.partial(_mlp_kernel, matmul_dtype=matmul_dtype)

    out_fm = pl.pallas_call(
        kernel,
        out_shape=jax.ShapeDtypeStruct((out_dim, B), jnp.float32),
        grid_spec=pltpu.PrefetchScalarGridSpec(
            num_scalar_prefetch=0,
            grid=grid,
            in_specs=[
                pl.BlockSpec((tile_b, in_dim), lambda i: (i, 0)),   # C, native layout
                _full_spec((hidden, in_dim)),
                _full_spec((hidden, 1)),
                _full_spec((hidden, hidden)),
                _full_spec((hidden, 1)),
                _full_spec((hidden, hidden)),
                _full_spec((hidden, 1)),
                _full_spec((out_dim, hidden)),
                _full_spec((out_dim, 1)),
            ],
            out_specs=pl.BlockSpec((out_dim, tile_b), lambda i: (0, i)),
        ),
        compiler_params=pltpu.CompilerParams(
            dimension_semantics=("parallel",)),
    )(C, w1, b1, w2, b2, w3, b3, w4, b4)

    # Feature-major [out_dim, B] -> batch-major [B, out_dim] (trivial for out_dim=1).
    # Partial last tile's out-of-bounds columns were masked on store.
    return out_fm.T


def init_mlp_params(key, input_size, output_size, hidden_size):
    """torch.nn.Linear default init (uniform +-1/sqrt(fan_in)), weights [out, in]."""
    dims = [(input_size, hidden_size), (hidden_size, hidden_size),
            (hidden_size, hidden_size), (hidden_size, output_size)]
    params = []
    for fan_in, fan_out in dims:
        key, kw, kb = jax.random.split(key, 3)
        bound = 1.0 / jnp.sqrt(fan_in)
        w = jax.random.uniform(kw, (fan_out, fan_in), jnp.float32, -bound, bound)
        b = jax.random.uniform(kb, (fan_out, 1), jnp.float32, -bound, bound)
        params += [w, b]
    return tuple(params)


def reference_forward(C, params):
    w1, b1, w2, b2, w3, b3, w4, b4 = params
    h = jnp.maximum(C @ w1.T + b1[:, 0], 0.0)
    h = jnp.maximum(h @ w2.T + b2[:, 0], 0.0)
    h = jnp.maximum(h @ w3.T + b3[:, 0], 0.0)
    return h @ w4.T + b4[:, 0]


if __name__ == "__main__":
    key = jax.random.PRNGKey(0)
    k_param, k_c = jax.random.split(key)

    INPUT_SIZE, OUTPUT_SIZE, HIDDEN_SIZE = 4, 1, 40
    B = 300  # deliberately NOT a multiple of the tile -> exercises masked last block

    C = jax.random.normal(k_c, (B, INPUT_SIZE), jnp.float32)
    params = init_mlp_params(k_param, INPUT_SIZE, OUTPUT_SIZE, HIDDEN_SIZE)

    ref = reference_forward(C, params)

    # Exact-parity f32 path (default).
    out = jax.block_until_ready(mlp_forward(C, params))
    assert out.shape == (B, OUTPUT_SIZE), out.shape
    assert jnp.allclose(out, ref, atol=1e-5, rtol=1e-5), "f32 kernel mismatch vs reference"

    # bf16 matmul-operand path (v6e/v7x MXU-rate win); f32 accumulation, looser tolerance.
    out_bf16 = jax.block_until_ready(mlp_forward(C, params, use_bf16=True))
    assert out_bf16.shape == (B, OUTPUT_SIZE), out_bf16.shape
    assert jnp.allclose(out_bf16, ref, atol=5e-2, rtol=5e-2), "bf16 kernel mismatch vs reference"

    print("KERNEL_OK")
</pallas_src>

<mosaic_0001>
module attributes {stable_mosaic.version = 11 : i64} {
  func.func @_mlp_kernel(%arg0: i32, %arg1: memref<256x4xf32, #tpu.memory_space<vmem>>, %arg2: memref<40x4xf32, #tpu.memory_space<vmem>>, %arg3: memref<40x1xf32, #tpu.memory_space<vmem>>, %arg4: memref<40x40xf32, #tpu.memory_space<vmem>>, %arg5: memref<40x1xf32, #tpu.memory_space<vmem>>, %arg6: memref<40x40xf32, #tpu.memory_space<vmem>>, %arg7: memref<40x1xf32, #tpu.memory_space<vmem>>, %arg8: memref<1x40xf32, #tpu.memory_space<vmem>>, %arg9: memref<1x1xf32, #tpu.memory_space<vmem>>, %arg10: memref<1x256xf32, #tpu.memory_space<vmem>>) attributes {dimension_semantics = [#tpu.dimension_semantics<parallel>], iteration_bounds = array<i64: 2>, scalar_prefetch = 0 : i64, scratch_operands = 0 : i64, tpu.core_type = #tpu.core_type<tc>, window_params = [{transform_indices = @transform_0, window_bounds = array<i64: 256, 4>}, {pipeline_mode = #tpu.pipeline_mode<synchronous>, transform_indices = @transform_1, window_bounds = array<i64: 40, 4>}, {pipeline_mode = #tpu.pipeline_mode<synchronous>, transform_indices = @transform_2, window_bounds = array<i64: 40, 1>}, {pipeline_mode = #tpu.pipeline_mode<synchronous>, transform_indices = @transform_3, window_bounds = array<i64: 40, 40>}, {pipeline_mode = #tpu.pipeline_mode<synchronous>, transform_indices = @transform_4, window_bounds = array<i64: 40, 1>}, {pipeline_mode = #tpu.pipeline_mode<synchronous>, transform_indices = @transform_5, window_bounds = array<i64: 40, 40>}, {pipeline_mode = #tpu.pipeline_mode<synchronous>, transform_indices = @transform_6, window_bounds = array<i64: 40, 1>}, {pipeline_mode = #tpu.pipeline_mode<synchronous>, transform_indices = @transform_7, window_bounds = array<i64: 1, 40>}, {pipeline_mode = #tpu.pipeline_mode<synchronous>, transform_indices = @transform_8, window_bounds = array<i64: 1, 1>}, {transform_indices = @transform_9, window_bounds = array<i64: 1, 256>}]} {
    %c0 = arith.constant 0 : index
    %c0_0 = arith.constant 0 : index
    %0 = vector.load %arg1[%c0, %c0_0] : memref<256x4xf32, #tpu.memory_space<vmem>>, vector<256x4xf32>
    %c0_1 = arith.constant 0 : index
    %c0_2 = arith.constant 0 : index
    %1 = vector.load %arg2[%c0_1, %c0_2] : memref<40x4xf32, #tpu.memory_space<vmem>>, vector<40x4xf32>
    %cst = arith.constant dense<0.000000e+00> : vector<40x256xf32>
    %2 = tpu.matmul %1, %0, %cst {dimension_numbers = #tpu.dot_dimension_numbers<[1], [1], [0], [0], [0, 0, 1, 0], [], []>} : vector<40x4xf32>, vector<256x4xf32>, vector<40x256xf32> -> vector<40x256xf32>
    %c0_3 = arith.constant 0 : index
    %c0_4 = arith.constant 0 : index
    %3 = vector.load %arg3[%c0_3, %c0_4] : memref<40x1xf32, #tpu.memory_space<vmem>>, vector<40x1xf32>
    %4 = vector.broadcast %3 : vector<40x1xf32> to vector<40x256xf32>
    %5 = arith.addf %2, %4 : vector<40x256xf32>
    %cst_5 = arith.constant 0.000000e+00 : f32
    %6 = vector.broadcast %cst_5 : f32 to vector<40x256xf32>
    %7 = arith.maximumf %5, %6 : vector<40x256xf32>
    %c0_6 = arith.constant 0 : index
    %c0_7 = arith.constant 0 : index
    %8 = vector.load %arg4[%c0_6, %c0_7] : memref<40x40xf32, #tpu.memory_space<vmem>>, vector<40x40xf32>
    %cst_8 = arith.constant dense<0.000000e+00> : vector<40x256xf32>
    %9 = tpu.matmul %8, %7, %cst_8 {dimension_numbers = #tpu.dot_dimension_numbers<[1], [0], [0], [1], [0, 0, 1, 1], [], []>} : vector<40x40xf32>, vector<40x256xf32>, vector<40x256xf32> -> vector<40x256xf32>
    %c0_9 = arith.constant 0 : index
    %c0_10 = arith.constant 0 : index
    %10 = vector.load %arg5[%c0_9, %c0_10] : memref<40x1xf32, #tpu.memory_space<vmem>>, vector<40x1xf32>
    %11 = vector.broadcast %10 : vector<40x1xf32> to vector<40x256xf32>
    %12 = arith.addf %9, %11 : vector<40x256xf32>
    %cst_11 = arith.constant 0.000000e+00 : f32
    %13 = vector.broadcast %cst_11 : f32 to vector<40x256xf32>
    %14 = arith.maximumf %12, %13 : vector<40x256xf32>
    %c0_12 = arith.constant 0 : index
    %c0_13 = arith.constant 0 : index
    %15 = vector.load %arg6[%c0_12, %c0_13] : memref<40x40xf32, #tpu.memory_space<vmem>>, vector<40x40xf32>
    %cst_14 = arith.constant dense<0.000000e+00> : vector<40x256xf32>
    %16 = tpu.matmul %15, %14, %cst_14 {dimension_numbers = #tpu.dot_dimension_numbers<[1], [0], [0], [1], [0, 0, 1, 1], [], []>} : vector<40x40xf32>, vector<40x256xf32>, vector<40x256xf32> -> vector<40x256xf32>
    %c0_15 = arith.constant 0 : index
    %c0_16 = arith.constant 0 : index
    %17 = vector.load %arg7[%c0_15, %c0_16] : memref<40x1xf32, #tpu.memory_space<vmem>>, vector<40x1xf32>
    %18 = vector.broadcast %17 : vector<40x1xf32> to vector<40x256xf32>
    %19 = arith.addf %16, %18 : vector<40x256xf32>
    %cst_17 = arith.constant 0.000000e+00 : f32
    %20 = vector.broadcast %cst_17 : f32 to vector<40x256xf32>
    %21 = arith.maximumf %19, %20 : vector<40x256xf32>
    %c0_18 = arith.constant 0 : index
    %c0_19 = arith.constant 0 : index
    %22 = vector.load %arg8[%c0_18, %c0_19] : memref<1x40xf32, #tpu.memory_space<vmem>>, vector<1x40xf32>
    %cst_20 = arith.constant dense<0.000000e+00> : vector<1x256xf32>
    %23 = tpu.matmul %22, %21, %cst_20 {dimension_numbers = #tpu.dot_dimension_numbers<[1], [0], [0], [1], [0, 0, 1, 1], [], []>} : vector<1x40xf32>, vector<40x256xf32>, vector<1x256xf32> -> vector<1x256xf32>
    %c0_21 = arith.constant 0 : index
    %c0_22 = arith.constant 0 : index
    %24 = vector.load %arg9[%c0_21, %c0_22] : memref<1x1xf32, #tpu.memory_space<vmem>>, vector<1x1xf32>
    %25 = vector.broadcast %24 : vector<1x1xf32> to vector<1x256xf32>
    %26 = arith.addf %23, %25 : vector<1x256xf32>
    %c0_23 = arith.constant 0 : index
    %c0_24 = arith.constant 0 : index
    %27 = vector.load %arg10[%c0_23, %c0_24] : memref<1x256xf32, #tpu.memory_space<vmem>>, vector<1x256xf32>
    tpu.vector_store %arg10[%c0_23, %c0_24], %26 {strides = array<i32>} : memref<1x256xf32, #tpu.memory_space<vmem>>, vector<1x256xf32>,
    return
  }
  func.func @transform_0(%arg0: i32) -> (i32, i32) {
    %c0_i32 = arith.constant 0 : i32
    %c0_i32_0 = arith.constant 0 : i32
    return %arg0, %c0_i32 : i32, i32
  }
  func.func @transform_1(%arg0: i32) -> (i32, i32) {
    %c0_i32 = arith.constant 0 : i32
    %c0_i32_0 = arith.constant 0 : i32
    %c0_i32_1 = arith.constant 0 : i32
    return %c0_i32, %c0_i32_0 : i32, i32
  }
  func.func @transform_2(%arg0: i32) -> (i32, i32) {
    %c0_i32 = arith.constant 0 : i32
    %c0_i32_0 = arith.constant 0 : i32
    %c0_i32_1 = arith.constant 0 : i32
    return %c0_i32, %c0_i32_0 : i32, i32
  }
  func.func @transform_3(%arg0: i32) -> (i32, i32) {
    %c0_i32 = arith.constant 0 : i32
    %c0_i32_0 = arith.constant 0 : i32
    %c0_i32_1 = arith.constant 0 : i32
    return %c0_i32, %c0_i32_0 : i32, i32
  }
  func.func @transform_4(%arg0: i32) -> (i32, i32) {
    %c0_i32 = arith.constant 0 : i32
    %c0_i32_0 = arith.constant 0 : i32
    %c0_i32_1 = arith.constant 0 : i32
    return %c0_i32, %c0_i32_0 : i32, i32
  }
  func.func @transform_5(%arg0: i32) -> (i32, i32) {
    %c0_i32 = arith.constant 0 : i32
    %c0_i32_0 = arith.constant 0 : i32
    %c0_i32_1 = arith.constant 0 : i32
    return %c0_i32, %c0_i32_0 : i32, i32
  }
  func.func @transform_6(%arg0: i32) -> (i32, i32) {
    %c0_i32 = arith.constant 0 : i32
    %c0_i32_0 = arith.constant 0 : i32
    %c0_i32_1 = arith.constant 0 : i32
    return %c0_i32, %c0_i32_0 : i32, i32
  }
  func.func @transform_7(%arg0: i32) -> (i32, i32) {
    %c0_i32 = arith.constant 0 : i32
    %c0_i32_0 = arith.constant 0 : i32
    %c0_i32_1 = arith.constant 0 : i32
    return %c0_i32, %c0_i32_0 : i32, i32
  }
  func.func @transform_8(%arg0: i32) -> (i32, i32) {
    %c0_i32 = arith.constant 0 : i32
    %c0_i32_0 = arith.constant 0 : i32
    %c0_i32_1 = arith.constant 0 : i32
    return %c0_i32, %c0_i32_0 : i32, i32
  }
  func.func @transform_9(%arg0: i32) -> (i32, i32) {
    %c0_i32 = arith.constant 0 : i32
    %c0_i32_0 = arith.constant 0 : i32
    return %c0_i32, %arg0 : i32, i32
  }
}

</mosaic_0001>

<bundles_post_ra>
// kernel: mlp_forward.1
= control target key start
LH: loop header
LB: loop body
LE: loop exit
PB: predicated region body
PF: predicated region fallthrough
CT: control target
= control target key end

     0   :  { %s1708_s0 = inlined_call_operand.vmem [shape: f32[300,4], index: 0, kind: input, shape index: {}]   ;;  %s1709_s1 = inlined_call_operand.vmem [shape: f32[40,4], index: 1, kind: input, shape index: {}]   ;;  %s1710_s2 = inlined_call_operand.vmem [shape: f32[40,1], index: 2, kind: input, shape index: {}]   ;;  %s1711_s3 = inlined_call_operand.vmem [shape: f32[40,40], index: 3, kind: input, shape index: {}]   ;;  %s1712_s4 = inlined_call_operand.vmem [shape: f32[40,1], index: 4, kind: input, shape index: {}]   ;;  %s1713_s5 = inlined_call_operand.vmem [shape: f32[40,40], index: 5, kind: input, shape index: {}]   ;;  %s1714_s6 = inlined_call_operand.vmem [shape: f32[40,1], index: 6, kind: input, shape index: {}]   ;;  %s1715_s7 = inlined_call_operand.vmem [shape: f32[1,40], index: 7, kind: input, shape index: {}]   ;;  %s1716_s8 = inlined_call_operand.<no memory space> [shape: f32[1,1], index: 8, kind: input, shape index: {}]   ;;  %s1717_s9 = inlined_call_operand.hbm [shape: f32[1,300], index: 9, kind: output, shape index: {}]  }
   0x1   :  { %v14_v0 = vstv %s1716_s8 }
   0x2   :  { %15 = vst [vmem:[#allocation2] sm:$0x1] %v14_v0 }
   0x3   :  { %16 = vsyncpa [#allocation4], 0 }
   0x4   :  { %18 = vsyncpa [#allocation4 + $0x1], 0  ;;  %s1409_s11 = smov 0   ;;  %s1411_s12 = smov 0  }
   0x5   :  { %s1413_s13 = smov 0   ;;  %s1415_s14 = smov 0  }
   0x6 LB: > { %s1430_s8 = sadd.s32 4294967295, %s1350_s14   ;;  %s1142_s15 = sadd.s32 4294967294, %s1350_s14   ;;  %s1350_s14 = sphi %s1415_s14, %s1723_s14   ;;  %s1346_s13 = sphi %s1413_s13, %s1722_s13   ;;  %s1342_s12 = sphi %s1411_s12, %s1721_s12   ;;  %s1338_s11 = sphi %s1409_s11, %s1720_s11  }
   0x7   : > { %s1434_s16 = sadd.s32 1, %s1350_s14   ;;  %s225_s17 = sadd.s32 1, %s1346_s13 }
   0x8   : > { %s222_s18 = ssub.s32 %s1350_s14, %s1434_s16  ;;  %p235_p0 = scmp.ne.s32.totalorder %s1346_s13, %s1342_s12 }
   0x9   : > { %p223_p1 = scmp.eq.s32.totalorder %s222_s18, 0  ;;  %p236_p2 = scmp.eq.s32.totalorder %s1430_s8, 1 }
   0xa   : > { %p241_p3 = scmp.ne.s32.totalorder %s1342_s12, %s1338_s11  ;;  %p242_p4 = scmp.eq.s32.totalorder %s1142_s15, 1 }
   0xb   : > { %s1445_s19 = scalar_select %p223_p1, %s1346_s13, %s225_s17  }
   0xc   : > { %p1447_p5 = por %p236_p2, %p235_p0  ;;  %p1451_p6 = por %p242_p4, %p241_p3 }
   0xd   : > { %p1145_p7 = scmp.ge.s32.totalorder %s1350_s14, 1  ;;  %p301_p8 = scmp.lt.s32.totalorder %s1350_s14, 3 }
   0xf   : > { %p302_p9 = pnand %p1145_p7, %p301_p8 }
  0x10   : > { %s1458_s22 = sshll.u32 (!%p302_p9), %s1430_s8, 5  ;;  %s338_s10 = sand.u32 (!%p302_p9), 1, %s1342_s12  }
  0x11   : > { %305 = sbr.rel (%p302_p9) target bundleno = 996 (0x3e4), region = 56  ;;  %p346_p10 = scmp.lt.s32.totalorder (!%p302_p9), %s1458_s22, 37 }
  0x12   : > { %s1146_s15 = sshll.u32 (!%p302_p9), %s338_s10, 1 }
  0x13   : > { %s340_s17 = scalar_lea.vmem (!%p302_p9), [#allocation3], %s1146_s15 }
  0x16   : > { %vm427_vm0 = vcmask 31744   ;;  %v1463_v1 = vld [vmem:[%s1709_s1] sm:$0xff]  ;;  %v1352_v2 = vmov 0   ;;  %v399_v4 = vld [vmem:[%s1710_s2 + $0x10] sm:$0xff]  ;;  %s347_s29 = scalar_select %p346_p10, %s1458_s22, 37  ;;  %v400_v5 = vld [vmem:[%s1710_s2 + $0x18] sm:$0xff] }
  0x17   : > { %1237 = vmatprep.mubr.msk.f32.mxu0 %vm427_vm0, %v1463_v1  ;;  %1288 = vset.pattern.permute.xlu0 %v1352_v2  ;;  %v401_v3 = vld [vmem:[%s1710_s2 + $0x20] sm:$0xff]  ;;  %v398_v6 = vld [vmem:[%s1710_s2 + $0x8] sm:$0xff]  ;;  %v652_v14 = vld [vmem:[%s1712_s4 + $0x18] sm:$0xff]  ;;  %v1353_v55 = vmov 0.0   ;;  %vm679_vm1 = vcmask 326656   ;;  %s1198_s23 = sshll.u32 (%p1447_p5), %s1430_s8, 1 }
  0x18   : > { %424 = vperm.xlu0 %1288, %v401_v3   ;;  %1289 = vset.pattern.permute.xlu1 %v1352_v2  ;;  %s1148_s18 = sshll.u32 %s347_s29, 3  ;;  %v397_v7 = vld [vmem:[%s1710_s2] sm:$0xff]  ;;  %v651_v15 = vld [vmem:[%s1712_s4 + $0x10] sm:$0xff]  ;;  %v650_v18 = vld [vmem:[%s1712_s4 + $0x8] sm:$0xff]  ;;  %s1072_s24 = ssub.s32 (%p1447_p5), 3, %s1198_s23 }
  0x19   : > { %414 = vperm.xlu1 %1289, %v399_v4   ;;  %s1484_s25 = scalar_lea.vmem %s1708_s0, %s1148_s18  ;;  %v653_v11 = vld [vmem:[%s1712_s4 + $0x20] sm:$0xff]  ;;  %v808_v23 = vld [vmem:[%s1714_s6 + $0x18] sm:$0xff]  ;;  %v807_v26 = vld [vmem:[%s1714_s6 + $0x10] sm:$0xff]  ;;  %759 = vmatprep.mubr.f32.mxu1 %v1353_v55  ;;  %s1661_s18 = scalar_lea.sflag [#allocation4], %s338_s10 }
  0x1a   : > { %v391_v8 = vld [vmem:[%s1484_s25 + $0xf8] sm:$0xff]  ;;  %v390_v10 = vld [vmem:[%s1484_s25 + $0xf0] sm:$0xff]  ;;  %v389_v13 = vld [vmem:[%s1484_s25 + $0xe8] sm:$0xff]  ;;  %p1073_p11 = scmp.lt.s32.totalorder (%p1447_p5), %s1072_s24, 2 }
  0x1b   : > { %v375_v9 = vld [vmem:[%s1484_s25 + $0x78] sm:$0xff]  ;;  %1205 = vmatprep.subr.msk.mxu0 %vm427_vm0, %v391_v8  ;;  %v374_v12 = vld [vmem:[%s1484_s25 + $0x70] sm:$0xff]  ;;  %v373_v16 = vld [vmem:[%s1484_s25 + $0x68] sm:$0xff] }
  0x1c   : > { %419 = vperm.xlu0 %1288, %v400_v5   ;;  %1206 = vmatpush3.xpose.msk.msra.mxu0 %vm427_vm0, %v375_v9  ;;  %v388_v17 = vld [vmem:[%s1484_s25 + $0xe0] sm:$0xff]  ;;  %v387_v21 = vld [vmem:[%s1484_s25 + $0xd8] sm:$0xff]  ;;  %v386_v25 = vld [vmem:[%s1484_s25 + $0xd0] sm:$0xff] }
  0x1d   : > { %409 = vperm.xlu1 %1289, %v398_v6   ;;  %1207 = vmatprep.subr.msk.mxu0 %vm427_vm0, %v390_v10  ;;  %v649_v19 = vld [vmem:[%s1712_s4] sm:$0xff]  ;;  %v371_v24 = vld [vmem:[%s1484_s25 + $0x58] sm:$0xff]  ;;  %v806_v27 = vld [vmem:[%s1714_s6 + $0x8] sm:$0xff] }
  0x1e   : > { %v372_v20 = vld [vmem:[%s1484_s25 + $0x60] sm:$0xff]  ;;  %v370_v28 = vld [vmem:[%s1484_s25 + $0x50] sm:$0xff]  ;;  %v385_v29 = vld [vmem:[%s1484_s25 + $0xc8] sm:$0xff] }
  0x1f   : > { %v809_v22 = vld [vmem:[%s1714_s6 + $0x20] sm:$0xff]  ;;  %v369_v32 = vld [vmem:[%s1484_s25 + $0x48] sm:$0xff]  ;;  %v383_v35 = vld [vmem:[%s1484_s25 + $0xb8] sm:$0xff] }
  0x20   : > { %404 = vperm.xlu0 %1288, %v397_v7   ;;  %1208 = vmatpush3.xpose.msk.msra.mxu0 %vm427_vm0, %v374_v12  ;;  %v805_v30 = vld [vmem:[%s1714_s6] sm:$0xff]  ;;  %v367_v36 = vld [vmem:[%s1484_s25 + $0x38] sm:$0xff]  ;;  %v382_v37 = vld [vmem:[%s1484_s25 + $0xb0] sm:$0xff] }
  0x21   : > { %676 = vperm.xlu1 %1289, %v653_v11   ;;  %1209 = vmatprep.subr.msk.mxu0 %vm427_vm0, %v389_v13  ;;  %v956_v31 = vld [vmem:[#allocation2] sm:$0x1]  ;;  %v366_v38 = vld [vmem:[%s1484_s25 + $0x30] sm:$0xff]  ;;  %v381_v39 = vld [vmem:[%s1484_s25 + $0xa8] sm:$0xff] }
  0x22   : > { %v384_v33 = vld [vmem:[%s1484_s25 + $0xc0] sm:$0xff]  ;;  %v365_v40 = vld [vmem:[%s1484_s25 + $0x28] sm:$0xff]  ;;  %v379_v43 = vld [vmem:[%s1484_s25 + $0x98] sm:$0xff] }
  0x23   : > { %v368_v34 = vld [vmem:[%s1484_s25 + $0x40] sm:$0xff]  ;;  %v363_v44 = vld [vmem:[%s1484_s25 + $0x18] sm:$0xff]  ;;  %v378_v45 = vld [vmem:[%s1484_s25 + $0x90] sm:$0xff] }
  0x24   : > { %671 = vperm.xlu0 %1288, %v652_v14   ;;  %1210 = vmatpush3.xpose.msk.msra.mxu0 %vm427_vm0, %v373_v16  ;;  %v380_v41 = vld [vmem:[%s1484_s25 + $0xa0] sm:$0xff]  ;;  %v362_v46 = vld [vmem:[%s1484_s25 + $0x10] sm:$0xff]  ;;  %v377_v47 = vld [vmem:[%s1484_s25 + $0x88] sm:$0xff] }
  0x25   : > { %666 = vperm.xlu1 %1289, %v651_v15   ;;  %1211 = vmatprep.subr.msk.mxu0 %vm427_vm0, %v388_v17  ;;  %v364_v42 = vld [vmem:[%s1484_s25 + $0x20] sm:$0xff]  ;;  %v361_v48 = vld [vmem:[%s1484_s25 + $0x8] sm:$0xff]  ;;  %v394_v52 = vld [vmem:[%s1709_s1 + $0x10] sm:$0xff] }
  0x26   : > { %v376_v49 = vld [vmem:[%s1484_s25 + $0x80] sm:$0xff]  ;;  %v393_v51 = vld [vmem:[%s1709_s1 + $0x8] sm:$0xff]  ;;  %v395_v53 = vld [vmem:[%s1709_s1 + $0x18] sm:$0xff] }
  0x27   : > { %v360_v50 = vld [vmem:[%s1484_s25] sm:$0xff] }
  0x28   : > { %661 = vperm.xlu0 %1288, %v650_v18   ;;  %1212 = vmatpush3.xpose.msk.msra.mxu0 %vm427_vm0, %v372_v20  ;;  %v396_v54 = vld [vmem:[%s1709_s1 + $0x20] sm:$0xff] }
  0x29   : > { %656 = vperm.xlu1 %1289, %v649_v19   ;;  %1213 = vmatprep.subr.msk.mxu0 %vm427_vm0, %v387_v21 }
  0x2c   : > { %832 = vperm.xlu0 %1288, %v809_v22   ;;  %1214 = vmatpush3.xpose.msk.msra.mxu0 %vm427_vm0, %v371_v24 }
  0x2d   : > { %827 = vperm.xlu1 %1289, %v808_v23   ;;  %1215 = vmatprep.subr.msk.mxu0 %vm427_vm0, %v386_v25 }
  0x30   : > { %822 = vperm.xlu0 %1288, %v807_v26   ;;  %1216 = vmatpush3.xpose.msk.msra.mxu0 %vm427_vm0, %v370_v28  ;;  %v645_v28 = vld [vmem:[%s1711_s3 + $0x8] sm:$0xff] }
  0x31   : > { %817 = vperm.xlu1 %1289, %v806_v27   ;;  %1217 = vmatprep.subr.msk.mxu0 %vm427_vm0, %v385_v29  ;;  %v644_v27 = vld [vmem:[%s1711_s3] sm:$0xff]  ;;  %v646_v29 = vld [vmem:[%s1711_s3 + $0x10] sm:$0xff] }
  0x34   : > { %812 = vperm.xlu0 %1288, %v805_v30   ;;  %1218 = vmatpush3.xpose.msk.msra.mxu0 %vm427_vm0, %v369_v32  ;;  %v647_v30 = vld [vmem:[%s1711_s3 + $0x18] sm:$0xff] }
  0x35   : > { %959 = vperm.xlu1 %1289, %v956_v31   ;;  %1219 = vmatprep.subr.msk.mxu0 %vm427_vm0, %v384_v33  ;;  %v648_v31 = vld [vmem:[%s1711_s3 + $0x20] sm:$0xff] }
  0x38   : > { %1220 = vmatpush3.xpose.msk.msra.mxu0 %vm427_vm0, %v368_v34 }
  0x39   : > { %1221 = vmatprep.subr.msk.mxu0 %vm427_vm0, %v383_v35 }
  0x3c   : > { %1222 = vmatpush3.xpose.msk.msra.mxu0 %vm427_vm0, %v367_v36 }
  0x3d   : > { %1223 = vmatprep.subr.msk.mxu0 %vm427_vm0, %v382_v37 }
  0x40   : > { %1224 = vmatpush3.xpose.msk.msra.mxu0 %vm427_vm0, %v366_v38 }
  0x41   : > { %1225 = vmatprep.subr.msk.mxu0 %vm427_vm0, %v381_v39 }
  0x44   : > { %1226 = vmatpush3.xpose.msk.msra.mxu0 %vm427_vm0, %v365_v40 }
  0x45   : > { %1227 = vmatprep.subr.msk.mxu0 %vm427_vm0, %v380_v41 }
  0x48   : > { %1228 = vmatpush3.xpose.msk.msra.mxu0 %vm427_vm0, %v364_v42 }
  0x49   : > { %1229 = vmatprep.subr.msk.mxu0 %vm427_vm0, %v379_v43 }
  0x4c   : > { %1230 = vmatpush3.xpose.msk.msra.mxu0 %vm427_vm0, %v363_v44 }
  0x4d   : > { %1231 = vmatprep.subr.msk.mxu0 %vm427_vm0, %v378_v45 }
  0x50   : > { %1232 = vmatpush3.xpose.msk.msra.mxu0 %vm427_vm0, %v362_v46 }
  0x51   : > { %1233 = vmatprep.subr.msk.mxu0 %vm427_vm0, %v377_v47 }
  0x54   : > { %1234 = vmatpush3.xpose.msk.msra.mxu0 %vm427_vm0, %v361_v48 }
  0x55   : > { %1235 = vmatprep.subr.msk.mxu0 %vm427_vm0, %v376_v49 }
  0x58   : > { %1236 = vmatpush3.xpose.msk.msra.mxu0 %vm427_vm0, %v360_v50 }
  0x5b   : > { %1238 = vmatmul.mubr.msk.f32.vlgmr.msra.gmra.mxu0 %vm427_vm0, %v1463_v1 }
  0x5c   : > { %1239 = vmatprep.mubr.msk.f32.mxu0 %vm427_vm0, %v393_v51 }
  0x5f   : > { %1240 = vmatmul.mubr.msk.f32.gmra.mxu0 %vm427_vm0, %v393_v51 }
  0x60   : > { %1241 = vmatprep.mubr.msk.f32.mxu0 %vm427_vm0, %v394_v52 }
  0x63   : > { %1242 = vmatmul.mubr.msk.f32.gmra.mxu0 %vm427_vm0, %v394_v52 }
  0x64   : > { %1243 = vmatprep.mubr.msk.f32.mxu0 %vm427_vm0, %v395_v53 }
  0x67   : > { %1244 = vmatmul.mubr.msk.f32.gmra.mxu0 %vm427_vm0, %v395_v53 }
  0x68   : > { %1245 = vmatprep.mubr.msk.f32.mxu0 %vm427_vm0, %v396_v54 }
  0x6b   : > { %1246 = vmatmul.mubr.msk.f32.gmra.mxu0 %vm427_vm0, %v396_v54 }
  0x93   : > { %v425_v62 = vpop.permute.xlu0 %424 }
  0x94   : > { %v415_v1 = vpop.permute.xlu1 %414 }
  0x97   : > { %v420_v3 = vpop.permute.xlu0 %419 }
  0x98   : > { %v410_v11 = vpop.permute.xlu1 %409 }
  0x9b   : > { %v405_v16 = vpop.permute.xlu0 %404 }
  0x9c   : > { %v677_v38 = vpop.permute.xlu1 %676 }
  0x9f   : > { %v672_v41 = vpop.permute.xlu0 %671 }
  0xa0   : > { %v667_v43 = vpop.permute.xlu1 %666 }
  0xa3   : > { %v662_v51 = vpop.permute.xlu0 %661 }
 0x11b   : > { %v605_v56 = vpop.f32.mrf.mxu0 }
 0x11c   : > { %v606_v21 = vadd.f32 %v605_v56, %v405_v16 }
 0x11d   : > { %v607_v57 = vpop.f32.mrf.mxu0 }
 0x11e   : > { %v608_v19 = vadd.f32 %v607_v57, %v405_v16  ;;  %v634_v26 = vmax.f32 %v606_v21, 0.0  ;;  %v657_v57 = vpop.permute.xlu1 %656 }
 0x11f   : > { %v611_v58 = vpop.f32.mrf.mxu0 }
 0x120   : > { %v612_v17 = vadd.f32 %v611_v58, %v410_v11  ;;  %v635_v25 = vmax.f32 %v608_v19, 0.0 }
 0x121   : > { %v613_v59 = vpop.f32.mrf.mxu0 }
 0x122   : > { %v614_v14 = vadd.f32 %v613_v59, %v410_v11  ;;  %v636_v24 = vmax.f32 %v612_v17, 0.0 }
 0x123   : > { %v617_v60 = vpop.f32.mrf.mxu0 }
 0x124   : > { %v618_v12 = vadd.f32 %v617_v60, %v415_v1  ;;  %v637_v23 = vmax.f32 %v614_v14, 0.0 }
 0x125   : > { %v619_v61 = vpop.f32.mrf.mxu0 }
 0x126   : > { %v620_v9 = vadd.f32 %v619_v61, %v415_v1  ;;  %v638_v22 = vmax.f32 %v618_v12, 0.0 }
 0x127   : > { %v623_v63 = vpop.f32.mrf.mxu0 }
 0x128   : > { %v624_v8 = vadd.f32 %v623_v63, %v420_v3  ;;  %v639_v20 = vmax.f32 %v620_v9, 0.0 }
 0x129   : > { %v625_v0 = vpop.f32.mrf.mxu0 }
 0x12a   : > { %v626_v6 = vadd.f32 %v625_v0, %v420_v3  ;;  %v640_v18 = vmax.f32 %v624_v8, 0.0  ;;  %v804_v8 = vld [vmem:[%s1713_s5 + $0x20] sm:$0xff] }
 0x12b   : > { %v629_v2 = vpop.f32.mrf.mxu0 }
 0x12c   : > { %v630_v4 = vadd.f32 %v629_v2, %v425_v62  ;;  %v641_v15 = vmax.f32 %v626_v6, 0.0  ;;  %v802_v6 = vld [vmem:[%s1713_s5 + $0x10] sm:$0xff] }
 0x12d   : > { %v631_v5 = vpop.f32.mrf.mxu0 }
 0x12e   : > { %v632_v7 = vadd.f32 %v631_v5, %v425_v62  ;;  %v642_v13 = vmax.f32 %v630_v4, 0.0  ;;  %v800_v4 = vld [vmem:[%s1713_s5] sm:$0xff]  ;;  %v801_v5 = vld [vmem:[%s1713_s5 + $0x8] sm:$0xff] }
 0x130   : > { %v643_v10 = vmax.f32 %v632_v7, 0.0  ;;  %v803_v7 = vld [vmem:[%s1713_s5 + $0x18] sm:$0xff] }
 0x132   : > { %717 = vmatprep.subr.mxu1 %v643_v10 }
 0x133   : > { %718 = vmatpush1.msra.mxu1 %v642_v13 }
 0x134   : > { %719 = vmatprep.subr.mxu1 %v641_v15  ;;  %v833_v15 = vpop.permute.xlu0 %832 }
 0x135   : > { %720 = vmatpush1.msra.mxu1 %v640_v18  ;;  %v828_v18 = vpop.permute.xlu1 %827 }
 0x136   : > { %721 = vmatprep.subr.mxu1 %v639_v20 }
 0x137   : > { %722 = vmatpush1.msra.mxu1 %v638_v22 }
 0x138   : > { %723 = vmatprep.subr.mxu1 %v637_v23  ;;  %v823_v20 = vpop.permute.xlu0 %822 }
 0x139   : > { %724 = vmatpush1.msra.mxu1 %v636_v24 }
 0x13a   : > { %725 = vmatprep.subr.mxu1 %v635_v25 }
 0x13b   : > { %726 = vmatpush1.msra.mxu1 %v634_v26 }
 0x13c   : > { %1186 = vmatmul.mubr.msk.f32.vlgmr.msra.gmra.mxu1 %vm679_vm1, %v644_v27 }
 0x13d   : > { %765 = vmatprep.mubr.f32.mxu1 %v1353_v55 }
 0x140   : > { %1187 = vmatmul.mubr.msk.f32.gmra.mxu1 %vm679_vm1, %v645_v28 }
 0x141   : > { %771 = vmatprep.mubr.f32.mxu1 %v1353_v55 }
 0x144   : > { %1188 = vmatmul.mubr.msk.f32.gmra.mxu1 %vm679_vm1, %v646_v29 }
 0x145   : > { %777 = vmatprep.mubr.f32.mxu1 %v1353_v55 }
 0x148   : > { %1189 = vmatmul.mubr.msk.f32.gmra.mxu1 %vm679_vm1, %v647_v30 }
 0x149   : > { %783 = vmatprep.mubr.f32.mxu1 %v1353_v55 }
 0x14c   : > { %1190 = vmatmul.mubr.msk.f32.gmra.mxu1 %vm679_vm1, %v648_v31 }
 0x14d   : > { %914 = vmatprep.mubr.f32.mxu1 %v1353_v55 }
 0x1fc   : > { %v761_v32 = vpop.f32.mrf.mxu1 }
 0x1fd   : > { %v762_v62 = vadd.f32 %v761_v32, %v657_v57  ;;  %v813_v32 = vpop.permute.xlu0 %812 }
 0x1fe   : > { %v763_v33 = vpop.f32.mrf.mxu1 }
 0x1ff   : > { %v764_v60 = vadd.f32 %v763_v33, %v657_v57  ;;  %v790_v3 = vmax.f32 %v762_v62, 0.0 }
 0x200   : > { %v767_v34 = vpop.f32.mrf.mxu1 }
 0x201   : > { %v768_v58 = vadd.f32 %v767_v34, %v662_v51  ;;  %v791_v2 = vmax.f32 %v764_v60, 0.0 }
 0x202   : > { %v769_v35 = vpop.f32.mrf.mxu1 }
 0x203   : > { %v770_v54 = vadd.f32 %v769_v35, %v662_v51  ;;  %v792_v1 = vmax.f32 %v768_v58, 0.0 }
 0x204   : > { %v773_v36 = vpop.f32.mrf.mxu1 }
 0x205   : > { %v774_v52 = vadd.f32 %v773_v36, %v667_v43  ;;  %v793_v0 = vmax.f32 %v770_v54, 0.0 }
 0x206   : > { %v775_v37 = vpop.f32.mrf.mxu1 }
 0x207   : > { %v776_v49 = vadd.f32 %v775_v37, %v667_v43  ;;  %v794_v63 = vmax.f32 %v774_v52, 0.0  ;;  %v955_v43 = vld [vmem:[%s1715_s7] sm:$0x1] }
 0x208   : > { %v779_v39 = vpop.f32.mrf.mxu1 }
 0x209   : > { %v780_v48 = vadd.f32 %v779_v39, %v672_v41  ;;  %v795_v61 = vmax.f32 %v776_v49, 0.0 }
 0x20a   : > { %v781_v40 = vpop.f32.mrf.mxu1 }
 0x20b   : > { %v782_v46 = vadd.f32 %v781_v40, %v672_v41  ;;  %v796_v59 = vmax.f32 %v780_v48, 0.0 }
 0x20c   : > { %v785_v42 = vpop.f32.mrf.mxu1 }
 0x20d   : > { %v786_v44 = vadd.f32 %v785_v42, %v677_v38  ;;  %v797_v56 = vmax.f32 %v782_v46, 0.0  ;;  %v1354_v46 = vmov 1966171168  }
 0x20e   : > { %v787_v45 = vpop.f32.mrf.mxu1 }
 0x20f   : > { %v788_v47 = vadd.f32 %v787_v45, %v677_v38  ;;  %v798_v53 = vmax.f32 %v786_v44, 0.0  ;;  %v962_v44 = vlaneseq }
 0x211   : > { %v799_v50 = vmax.f32 %v788_v47, 0.0  ;;  %v963_v45 = vshrl.u32 %v962_v44, 7  ;;  %v1044_v47 = vunpack.c.l.s4 %v1354_v46  ;;  %vm1060_vm2 = vcmp.lt.s32.totalorder %v962_v44, 256 }
 0x213   : > { %872 = vmatprep.subr.mxu1 %v799_v50  ;;  %v964_v48 = vsub.s32 0, %v963_v45  ;;  %v1045_v50 = vunpack.c.0.s8 %v1044_v47 }
 0x214   : > { %873 = vmatpush1.msra.mxu1 %v798_v53 }
 0x215   : > { %874 = vmatprep.subr.mxu1 %v797_v56  ;;  %v1048_v57 = vsub.s32 %v1045_v50, %v963_v45 }
 0x216   : > { %875 = vmatpush1.msra.mxu1 %v796_v59 }
 0x217   : > { %876 = vmatprep.subr.mxu1 %v795_v61 }
 0x218   : > { %877 = vmatpush1.msra.mxu1 %v794_v63 }
 0x219   : > { %878 = vmatprep.subr.mxu1 %v793_v0 }
 0x21a   : > { %879 = vmatpush1.msra.mxu1 %v792_v1 }
 0x21b   : > { %880 = vmatprep.subr.mxu1 %v791_v2 }
 0x21c   : > { %881 = vmatpush1.msra.mxu1 %v790_v3 }
 0x21d   : > { %1191 = vmatmul.mubr.msk.f32.vlgmr.msra.gmra.mxu1 %vm679_vm1, %v800_v4 }
 0x21e   : > { %920 = vmatprep.mubr.f32.mxu1 %v1353_v55 }
 0x221   : > { %1192 = vmatmul.mubr.msk.f32.gmra.mxu1 %vm679_vm1, %v801_v5 }
 0x222   : > { %926 = vmatprep.mubr.f32.mxu1 %v1353_v55 }
 0x225   : > { %1193 = vmatmul.mubr.msk.f32.gmra.mxu1 %vm679_vm1, %v802_v6 }
 0x226   : > { %932 = vmatprep.mubr.f32.mxu1 %v1353_v55 }
 0x229   : > { %1194 = vmatmul.mubr.msk.f32.gmra.mxu1 %vm679_vm1, %v803_v7 }
 0x22a   : > { %938 = vmatprep.mubr.f32.mxu1 %v1353_v55 }
 0x22d   : > { %1195 = vmatmul.mubr.msk.f32.gmra.mxu1 %vm679_vm1, %v804_v8 }
 0x22e   : > { %1033 = vmatprep.mubr.f32.mxu1 %v1353_v55  ;;  %v818_v55 = vpop.permute.xlu1 %817 }
 0x232   : > { %v960_v49 = vpop.permute.xlu1 %959 }
 0x233   : > { %v965_v52 = vrot.slane %v960_v49, %v964_v48 }
 0x2dd   : > { %v916_v9 = vpop.f32.mrf.mxu1 }
 0x2de   : > { %v917_v37 = vadd.f32 %v916_v9, %v813_v32 }
 0x2df   : > { %v918_v10 = vpop.f32.mrf.mxu1 }
 0x2e0   : > { %v919_v35 = vadd.f32 %v918_v10, %v813_v32  ;;  %v945_v42 = vmax.f32 %v917_v37, 0.0 }
 0x2e1   : > { %v922_v11 = vpop.f32.mrf.mxu1 }
 0x2e2   : > { %v923_v33 = vadd.f32 %v922_v11, %v818_v55  ;;  %v946_v41 = vmax.f32 %v919_v35, 0.0 }
 0x2e3   : > { %v924_v12 = vpop.f32.mrf.mxu1 }
 0x2e4   : > { %v925_v30 = vadd.f32 %v924_v12, %v818_v55  ;;  %v947_v40 = vmax.f32 %v923_v33, 0.0 }
 0x2e5   : > { %v928_v13 = vpop.f32.mrf.mxu1 }
 0x2e6   : > { %v929_v28 = vadd.f32 %v928_v13, %v823_v20  ;;  %v948_v39 = vmax.f32 %v925_v30, 0.0 }
 0x2e7   : > { %v930_v14 = vpop.f32.mrf.mxu1 }
 0x2e8   : > { %v931_v26 = vadd.f32 %v930_v14, %v823_v20  ;;  %v949_v38 = vmax.f32 %v929_v28, 0.0 }
 0x2e9   : > { %v934_v16 = vpop.f32.mrf.mxu1 }
 0x2ea   : > { %v935_v25 = vadd.f32 %v934_v16, %v828_v18  ;;  %v950_v36 = vmax.f32 %v931_v26, 0.0 }
 0x2eb   : > { %v936_v17 = vpop.f32.mrf.mxu1 }
 0x2ec   : > { %v937_v23 = vadd.f32 %v936_v17, %v828_v18  ;;  %v951_v34 = vmax.f32 %v935_v25, 0.0 }
 0x2ed   : > { %v940_v19 = vpop.f32.mrf.mxu1 }
 0x2ee   : > { %v941_v21 = vadd.f32 %v940_v19, %v833_v15  ;;  %v952_v31 = vmax.f32 %v937_v23, 0.0 }
 0x2ef   : > { %v942_v22 = vpop.f32.mrf.mxu1 }
 0x2f0   : > { %v943_v24 = vadd.f32 %v942_v22, %v833_v15  ;;  %v953_v29 = vmax.f32 %v941_v21, 0.0 }
 0x2f2   : > { %v954_v27 = vmax.f32 %v943_v24, 0.0 }
 0x2f4   : > { %991 = vmatprep.subr.mxu1 %v954_v27 }
 0x2f5   : > { %992 = vmatpush1.msra.mxu1 %v953_v29 }
 0x2f6   : > { %993 = vmatprep.subr.mxu1 %v952_v31 }
 0x2f7   : > { %994 = vmatpush1.msra.mxu1 %v951_v34 }
 0x2f8   : > { %995 = vmatprep.subr.mxu1 %v950_v36 }
 0x2f9   : > { %996 = vmatpush1.msra.mxu1 %v949_v38 }
 0x2fa   : > { %997 = vmatprep.subr.mxu1 %v948_v39 }
 0x2fb   : > { %998 = vmatpush1.msra.mxu1 %v947_v40 }
 0x2fc   : > { %999 = vmatprep.subr.mxu1 %v946_v41 }
 0x2fd   : > { %1000 = vmatpush1.msra.mxu1 %v945_v42 }
 0x2fe   : > { %1196 = vmatmul.mubr.msk.f32.vlgmr.msra.gmra.mxu1 %vm679_vm1, %v955_v43 }
 0x3be   : > { %v1035_v51 = vpop.f32.mrf.mxu1 }
 0x3bf   : > { %v1036_v54 = vadd.f32 %v1035_v51, %v965_v52 }
 0x3c0   : > { %v1037_v53 = vpop.f32.mrf.mxu1 }
 0x3c1   : > { %v1038_v56 = vadd.f32 %v1037_v53, %v965_v52 }
 0x3c3   : > { %v1042_v58 = vcombine.low %v1036_v54, %v1038_v56 }
 0x3c5   : > { %v1049_v59 = vrot.slane %v1042_v58, %v1048_v57  ;;  %1070 = sbr.rel (!%p1447_p5) target bundleno = 996 (0x3e4), region = 60 }
 0x3c7   : > { %v1056_v60 = vrot.slane %v1049_v59, %v1048_v57 }
 0x3c9   : > { %1062 = vst.msk [vmem:[%s340_s17] sm:$0x3] %vm1060_vm2, %v1056_v60 }
 0x3ca   : > { %s1725_s24 = smov (!%p1073_p11, %s1072_s24), 2 }
 0x3cb   : > { %s1666_s26 = sshll.u32 %s1725_s24, 4 }
 0x3cc   : > { %s1077_s27 = ssub.s32 32, %s1666_s26 }
 0x3cd   : > { %1078 = vsyncadd %s1661_s18, %s1077_s27  ;;  %p1200_p12 = scmp.ne.s32.totalorder %s1666_s26, 0  ;;  %s1081_s20 = scalar_lea.hbm %s1717_s9, %s1458_s22 }
 0x3ce   : > { %s1083_s25 = sshll.u32 %s340_s17, 4  ;;  %s1355_s30 = smov [#allocation3]   ;;  %s1084_s25 = int_to_ptr.vmem [resolvable:$true] %s1083_s25 }
 0x3cf   : > { %s1290_s8 = scalar_lea.vmem %s1084_s25, %s1666_s26  ;;  %s1294_s10 = sshll.u32 %s1355_s30, 4  ;;  %s1295_s10 = int_to_ptr.vmem [resolvable:$false] %s1294_s10 }
 0x3d0   : > { %p1291_p13 = scmp.ne.s32.totalorder %s1084_s25, %s1290_s8  ;;  %s1296_s15 = scalar_lea.vmem %s1295_s10, 64 }
 0x3d1   : > { %p1297_p2 = scmp.lt.s32.totalorder %s1084_s25, %s1295_s10  ;;  %p1298_p3 = scmp.lt.s32.totalorder %s1296_s15, %s1290_s8 }
 0x3d2   : > { %p1292_p0 = pnand %p1291_p13, %p1200_p12 }
 0x3d3   : > { %p1299_p4 = por %p1298_p3, %p1297_p2 }
 0x3d4   : > { %p1293_p1 = pneg %p1292_p0 }
 0x3d6   : > { %p1300_p5 = pnand %p1299_p4, %p1293_p1 }
 0x3d8   : > { %1303 = shalt.err (!%p1300_p5)
}
 0x3d9   : > { %s1304_s23 = scalar_lea.hbm %s1081_s20, %s1666_s26  ;;  %s1308_s24 = scalar_lea.hbm %s1717_s9, 48 }
 0x3da   : > { %p1305_p7 = scmp.ne.s32.totalorder %s1081_s20, %s1304_s23  ;;  %p1309_p10 = scmp.lt.s32.totalorder %s1081_s20, %s1717_s9 }
 0x3db   : > { %p1310_p11 = scmp.lt.s32.totalorder %s1308_s24, %s1304_s23 }
 0x3dc   : > { %p1306_p8 = pnand %p1305_p7, %p1200_p12 }
 0x3dd   : > { %p1311_p13 = por %p1310_p11, %p1309_p10 }
 0x3de   : > { %p1307_p9 = pneg %p1306_p8 }
 0x3e0   : > { %p1312_p0 = pnand %p1311_p13, %p1307_p9 }
 0x3e2   : > { %1315 = shalt.err (!%p1312_p0)
}
 0x3e3   : > { %1086 = dma.vmem_to_hbm [thread:$0]  (%p1200_p12), %s1084_s25, %s1666_s26, %s1081_s20, %s1661_s18  }
 0x3e4 PF: > { %p1252_p1 = scmp.ge.s32.totalorder %s1350_s14, 2  ;;  %s1095_s29 = sand.u32 1, %s1338_s11  }
 0x3e5   : > { %s1096_s8 = scalar_lea.sflag [#allocation4], %s1095_s29 }
 0x3e6   : > { %p1249_p2 = pnand %p1252_p1, %p1451_p6 }
 0x3e8   : > { %p1250_p3 = pneg %p1249_p2 }
 0x3ea   : > { %1333 = dma.done.wait (%p1250_p3), %s1096_s8, 32  }
 0x3eb   : > { %1335 = vsyncadd (%p1250_p3), %s1096_s8, 4294967264  ;;  %p21_p4 = scmp.ge.s32.totalorder %s1434_s16, 4   ;;  %s1720_s11 = smov %s1342_s12 }
 0x3ec   : > { %s1721_s12 = smov %s1346_s13  ;;  %s1722_s13 = smov %s1445_s19 }
 0x3ed   : > { %s1723_s14 = smov %s1434_s16  ;;  %23 = sbr.rel (!%p21_p4) target bundleno = 6 (0x6), region = 91 }
 0x3f2   :  { %1101 = vsyncpa [#allocation4], 1 }
 0x3f3   :  { %1103 = vsyncpa [#allocation4 + $0x1], 1 }

</bundles_post_ra>
